<compile_context>
chip_gen: v5e
topology: v5e:2x2
jax: 0.10.0
libtpu: 0.0.40
codegen_flags: <defaults>
</compile_context>

<pallas_src>
import functools

import numpy as np
import jax
import jax.numpy as jnp
from jax.experimental import pallas as pl
from jax.experimental.pallas import tpu as pltpu


def _rope2d_kernel(cos_ref, sin_ref, x_ref, o_ref):
    # Block shapes: cos/sin (TH, TWD) f32; x/o (1, TH, TWD) in image dtype.
    x = x_ref[0].astype(jnp.float32)
    twd = x.shape[-1]
    # Partner of an even channel c is c+1, of an odd channel c is c-1.
    # roll by twd-1 (== jnp.roll(x, -1, axis=-1)) brings x[c+1] to lane c;
    # roll by 1    (== jnp.roll(x, +1, axis=-1)) brings x[c-1] to lane c.
    # Wrapped lanes (lane twd-1 for x_next, lane 0 for x_prev) are never
    # selected because twd is even (full WD = W*D with D % 4 == 0, or a
    # multiple-of-128 split of it).
    x_next = pltpu.roll(x, shift=twd - 1, axis=1)
    x_prev = pltpu.roll(x, shift=1, axis=1)
    lane = jax.lax.broadcasted_iota(jnp.int32, (1, twd), 1)
    partner = jnp.where((lane & 1) == 0, x_next, x_prev)
    o_ref[0] = (x * cos_ref[...] + partner * sin_ref[...]).astype(o_ref.dtype)


@functools.lru_cache(maxsize=32)
def _rope2d_tables(H, W, D, base):
    """Batch-independent cos / signed-sin tables, shape (H, W*D), f32.

    Built once per (H, W, D, base) on the host and cached, so repeated calls
    pay nothing but the Pallas kernel itself.
    """
    valid_dim = D // 2
    # theta (module __init__): base ** (-arange(0, D//2, 2) / (D//2)); len D//4.
    theta = np.asarray(base, np.float32) ** (
        -np.arange(0, valid_dim, 2, dtype=np.float32)[: valid_dim // 2]
        / valid_dim)                                        # (D//4,)
    c = np.arange(D)
    th_c = theta[c // 4]                                    # (D,)
    xy = (c // 2) % 2
    ab = c % 2
    h_idx = np.arange(H, dtype=np.float32)[:, None, None]
    w_idx = np.arange(W, dtype=np.float32)[None, :, None]
    ang = np.where(xy == 0, h_idx * th_c, w_idx * th_c)     # (H, W, D)
    cos_t = np.cos(ang).astype(np.float32).reshape(H, W * D)
    sin_t = (np.sin(ang) * np.where(ab == 0, -1.0, 1.0)).astype(
        np.float32).reshape(H, W * D)
    return jnp.asarray(cos_t), jnp.asarray(sin_t)


def _tpu_block_config():
    """Per-generation (target image-block bytes, scoped-VMEM limit bytes)."""
    kind = ""
    try:
        kind = jax.devices()[0].device_kind.lower()
    except Exception:
        pass
    if "v5 lite" in kind or "v5lite" in kind or "v5e" in kind:
        # ~0.8 TB/s HBM: 2 MiB blocks keep per-step overhead small; the
        # 8 in-flight blocks (16 MiB) exceed the 16 MiB scoped default.
        return 2 << 20, 32 << 20
    if "v6" in kind:
        # ~1.4 TB/s HBM, 128 MiB physical VMEM: 4 MiB blocks, generous limit.
        return 4 << 20, 64 << 20
    if "v7" in kind:
        # Higher per-TC HBM BW but only 64 MiB physical VMEM per TC:
        # 3 MiB blocks -> ~24 MiB in flight, limit raised but well under 64.
        return 3 << 20, 44 << 20
    # Unknown backend: conservative values that fit every generation.
    return 2 << 20, 32 << 20


def _pick_tiles(H, WD, max_block_elems, total_batch, min_steps=4):
    """Choose (TH, TWD).

    TH is a multiple-of-8 divisor of H (or H itself); TWD is a multiple-of-128
    divisor of WD (or WD itself) -- satisfying the (8, 128) block constraint.
    The full lane-dense WD width is preferred; WD is only split (at an even,
    128-aligned boundary, so channel pairs never straddle a block) when even
    8 rows of the full width exceed the VMEM-derived element budget.
    """
    th_cands = sorted({d for d in range(8, H + 1, 8) if H % d == 0} | {H})
    twd_cands = sorted({d for d in range(128, WD + 1, 128) if WD % d == 0} | {WD})

    th, twd = min(th_cands), min(twd_cands)   # last-resort fallback
    for cand_twd in reversed(twd_cands):      # widest (lane-dense) first
        fitting = [t for t in th_cands if t * cand_twd <= max_block_elems]
        if fitting:
            th, twd = max(fitting), cand_twd
            break

    # Expose at least `min_steps` grid steps (v7x shards "parallel" axes over
    # 2 TensorCores; also keeps double-buffering busy) by shrinking TH.
    n_wd = WD // twd
    if (H // th) * n_wd * total_batch < min_steps:
        best = th
        for t in th_cands:                    # ascending -> ends at largest ok
            if t <= th and (H // t) * n_wd * total_batch >= min_steps:
                best = t
        if best == th:
            smallest = min(th_cands)
            if (H // smallest) * n_wd * total_batch > (H // th) * n_wd * total_batch:
                best = smallest
        th = best
    return th, twd


def rope2d(image, base=10000.0):
    B, H, W, D = image.shape
    assert D % 4 == 0, f"dim={D} must be divisible by 4!"

    # Cached, batch-independent tables (no per-call cos/sin compute).
    cos_t, sin_t = _rope2d_tables(int(H), int(W), int(D), float(base))

    WD = W * D
    x_flat = image.reshape(B, H, WD)          # free reshape, lane-dense rows

    target_block_bytes, vmem_limit = _tpu_block_config()
    # Budget in elements per block; the f32 tables dominate the per-element
    # size for <=4-byte image dtypes.
    elem_bytes = max(image.dtype.itemsize, 4)
    max_block_elems = max(target_block_bytes // elem_bytes, 8 * 128)
    TH, TWD = _pick_tiles(H, WD, max_block_elems, B)
    n_hb, n_wd = H // TH, WD // TWD

    tbl_spec = pl.BlockSpec((TH, TWD), lambda h, w, b: (h, w))
    img_spec = pl.BlockSpec((1, TH, TWD), lambda h, w, b: (b, h, w))

    out = pl.pallas_call(
        _rope2d_kernel,
        # b is the fastest grid axis: the batch-independent table blocks keep
        # the same block index for B consecutive steps, so their re-DMA is
        # skipped across the batch.  All axes are independent -> "parallel".
        grid=(n_hb, n_wd, B),
        in_specs=[tbl_spec, tbl_spec, img_spec],
        out_specs=img_spec,
        out_shape=jax.ShapeDtypeStruct((B, H, WD), image.dtype),
        compiler_params=pltpu.CompilerParams(
            dimension_semantics=("parallel", "parallel", "parallel"),
            vmem_limit_bytes=vmem_limit),
    )(cos_t, sin_t, x_flat)

    return out.reshape(B, H, W, D)


def rope2d_ref(image, base=10000.0):
    """Pure numpy reference mirroring RoPE2D.forward_v2."""
    B, H, W, D = image.shape
    valid_dim = D // 2
    theta = np.asarray(base, np.float32) ** (
        -np.arange(0, valid_dim, 2, dtype=np.float32)[: valid_dim // 2]
        / valid_dim)
    c = np.arange(D)
    d = c // 4
    xy = (c // 2) % 2
    ab = c % 2
    th = theta[d]
    h_idx = np.arange(H, dtype=np.float32)[:, None, None]
    w_idx = np.arange(W, dtype=np.float32)[None, :, None]
    ang = np.where(xy == 0, h_idx * th, w_idx * th)         # (H, W, D)
    cos, sin = np.cos(ang), np.sin(ang)
    x = np.asarray(image, np.float32)
    partner = np.where(ab == 0, c + 1, c - 1)
    xp = x[..., partner]
    out = np.where(ab == 0, x * cos - xp * sin, xp * sin + x * cos)
    return out.astype(image.dtype)


if __name__ == "__main__":
    key = jax.random.PRNGKey(0)
    B, H, W, D = 2, 16, 16, 32
    image = jax.random.normal(key, (B, H, W, D), dtype=jnp.float32)

    out = jax.block_until_ready(rope2d(image))

    ref = rope2d_ref(np.asarray(image))
    np.testing.assert_allclose(np.asarray(out), ref, rtol=1e-5, atol=1e-5)
    print("KERNEL_OK")
</pallas_src>

<mosaic_0001>
module attributes {stable_mosaic.version = 11 : i64} {
  func.func @_rope2d_kernel(%arg0: i32, %arg1: i32, %arg2: i32, %arg3: memref<8x512xf32, #tpu.memory_space<vmem>>, %arg4: memref<8x512xf32, #tpu.memory_space<vmem>>, %arg5: memref<1x8x512xf32, #tpu.memory_space<vmem>>, %arg6: memref<1x8x512xf32, #tpu.memory_space<vmem>>) attributes {dimension_semantics = [#tpu.dimension_semantics<parallel>, #tpu.dimension_semantics<parallel>, #tpu.dimension_semantics<parallel>], iteration_bounds = array<i64: 2, 1, 2>, scalar_prefetch = 0 : i64, scratch_operands = 0 : i64, tpu.core_type = #tpu.core_type<tc>, window_params = [{transform_indices = @transform_0, window_bounds = array<i64: 8, 512>}, {transform_indices = @transform_1, window_bounds = array<i64: 8, 512>}, {transform_indices = @transform_2, window_bounds = array<i64: 1, 8, 512>}, {transform_indices = @transform_3, window_bounds = array<i64: 1, 8, 512>}]} {
    %c0 = arith.constant 0 : index
    %c0_0 = arith.constant 0 : index
    %c0_1 = arith.constant 0 : index
    %0 = vector.load %arg5[%c0, %c0_0, %c0_1] : memref<1x8x512xf32, #tpu.memory_space<vmem>>, vector<1x8x512xf32>
    %1 = vector.shape_cast %0 : vector<1x8x512xf32> to vector<8x512xf32>
    %c511_i32 = arith.constant 511 : i32
    %2 = tpu.dynamic_rotate %1 by %c511_i32 dim 1 : vector<8x512xf32>, i32 -> vector<8x512xf32>
    %c1_i32 = arith.constant 1 : i32
    %3 = tpu.dynamic_rotate %1 by %c1_i32 dim 1 : vector<8x512xf32>, i32 -> vector<8x512xf32>
    %4 = tpu.iota {dimensions = array<i32: 1>} : vector<1x512xi32>
    %c1_i32_2 = arith.constant 1 : i32
    %5 = vector.broadcast %c1_i32_2 : i32 to vector<1x512xi32>
    %6 = arith.andi %4, %5 : vector<1x512xi32>
    %c0_i32 = arith.constant 0 : i32
    %7 = vector.broadcast %c0_i32 : i32 to vector<1x512xi32>
    %8 = arith.cmpi eq, %6, %7 : vector<1x512xi32>
    %9 = vector.shape_cast %8 : vector<1x512xi1> to vector<1x512xi1>
    %10 = vector.broadcast %9 : vector<1x512xi1> to vector<8x512xi1>
    %11 = arith.select %10, %2, %3 : vector<8x512xi1>, vector<8x512xf32>
    %c0_3 = arith.constant 0 : index
    %c0_4 = arith.constant 0 : index
    %12 = vector.load %arg3[%c0_3, %c0_4] : memref<8x512xf32, #tpu.memory_space<vmem>>, vector<8x512xf32>
    %13 = arith.mulf %1, %12 : vector<8x512xf32>
    %c0_5 = arith.constant 0 : index
    %c0_6 = arith.constant 0 : index
    %14 = vector.load %arg4[%c0_5, %c0_6] : memref<8x512xf32, #tpu.memory_space<vmem>>, vector<8x512xf32>
    %15 = arith.mulf %11, %14 : vector<8x512xf32>
    %16 = arith.addf %13, %15 : vector<8x512xf32>
    %c0_7 = arith.constant 0 : index
    %c0_8 = arith.constant 0 : index
    %c0_9 = arith.constant 0 : index
    %17 = vector.load %arg6[%c0_7, %c0_8, %c0_9] : memref<1x8x512xf32, #tpu.memory_space<vmem>>, vector<1x8x512xf32>
    %18 = vector.shape_cast %17 : vector<1x8x512xf32> to vector<8x512xf32>
    %19 = vector.shape_cast %16 : vector<8x512xf32> to vector<1x8x512xf32>
    tpu.vector_store %arg6[%c0_7, %c0_8, %c0_9], %19 {strides = array<i32>} : memref<1x8x512xf32, #tpu.memory_space<vmem>>, vector<1x8x512xf32>,
    return
  }
  func.func @transform_0(%arg0: i32, %arg1: i32, %arg2: i32) -> (i32, i32) {
    %c0_i32 = arith.constant 0 : i32
    return %arg0, %arg1 : i32, i32
  }
  func.func @transform_1(%arg0: i32, %arg1: i32, %arg2: i32) -> (i32, i32) {
    %c0_i32 = arith.constant 0 : i32
    return %arg0, %arg1 : i32, i32
  }
  func.func @transform_2(%arg0: i32, %arg1: i32, %arg2: i32) -> (i32, i32, i32) {
    %c0_i32 = arith.constant 0 : i32
    return %arg2, %arg0, %arg1 : i32, i32, i32
  }
  func.func @transform_3(%arg0: i32, %arg1: i32, %arg2: i32) -> (i32, i32, i32) {
    %c0_i32 = arith.constant 0 : i32
    return %arg2, %arg0, %arg1 : i32, i32, i32
  }
}

</mosaic_0001>

<bundles_post_ra>
// kernel: tpu_custom_call.1
= control target key start
LH: loop header
LB: loop body
LE: loop exit
PB: predicated region body
PF: predicated region fallthrough
CT: control target
= control target key end

     0   :  { %s1217_s0 = inlined_call_operand.hbm [shape: f32[16,512], index: 0, kind: input, shape index: {}]   ;;  %s1218_s1 = inlined_call_operand.hbm [shape: f32[16,512], index: 1, kind: input, shape index: {}]   ;;  %s1219_s2 = inlined_call_operand.hbm [shape: f32[2,16,512], index: 2, kind: input, shape index: {}]   ;;  %s1220_s3 = inlined_call_operand.hbm [shape: f32[2,16,512], index: 3, kind: output, shape index: {}]  }
   0x1   :  { %1228 = sst [smem:[#allocation20_spill]] %s1217_s0 }
   0x2   :  { %1229 = sst [smem:[#allocation21_spill]] %s1218_s1 }
   0x3   :  { %1230 = sst [smem:[#allocation22_spill]] %s1220_s3 }
   0x4   :  { %8 = vsyncpa [#allocation3], 0 }
   0x5   :  { %10 = vsyncpa [#allocation3 + $0x1], 0 }
   0x6   :  { %11 = vsyncpa [#allocation6], 0 }
   0x7   :  { %13 = vsyncpa [#allocation6 + $0x1], 0 }
   0x8   :  { %14 = vsyncpa [#allocation4], 0 }
   0x9   :  { %16 = vsyncpa [#allocation4 + $0x1], 0  ;;  %s937_s12 = smov 0   ;;  %s939_s13 = smov 0  }
   0xa   :  { %s941_s14 = smov 0   ;;  %s943_s15 = smov 0  }
   0xb   :  { %s945_s16 = smov 0   ;;  %s947_s17 = smov 0  }
   0xc   :  { %s949_s18 = smov 0   ;;  %s951_s19 = smov 0  }
   0xd   :  { %s953_s20 = smov 0   ;;  %s955_s21 = smov 0  }
   0xe   :  { %s957_s22 = smov 0  }
   0xf LB: > { %1231 = sst [smem:[#allocation13_spill]] %s873_s12  ;;  %s991_s23 = sadd.s32 4294967295, %s913_s22   ;;  %s913_s22 = sphi %s957_s22, %s22_s22   ;;  %s909_s21 = sphi %s955_s21, %s1272_s21   ;;  %s905_s20 = sphi %s953_s20, %s1271_s20   ;;  %s901_s19 = sphi %s951_s19, %s1270_s19   ;;  %s897_s18 = sphi %s949_s18, %s1269_s18   ;;  %s893_s17 = sphi %s947_s17, %s1268_s17   ;;  %s889_s16 = sphi %s945_s16, %s1267_s16   ;;  %s885_s15 = sphi %s943_s15, %s1266_s15   ;;  %s881_s14 = sphi %s941_s14, %s1265_s14   ;;  %s877_s13 = sphi %s939_s13, %s1264_s13   ;;  %s873_s12 = sphi %s937_s12, %s1263_s12  }
  0x10   : > { %1232 = sst [smem:[#allocation14_spill]] %s897_s18  ;;  %p57_p0 = scmp.ne.s32.totalorder %s893_s17, %s889_s16 }
  0x11   : > { %1233 = sst [smem:[#allocation15_spill]] %s901_s19  ;;  %p58_p1 = scmp.eq.s32.totalorder %s913_s22, 0 }
  0x12   : > { %p63_p2 = scmp.ne.s32.totalorder %s889_s16, %s885_s15  ;;  %p64_p3 = scmp.eq.s32.totalorder %s991_s23, 0 }
  0x13   : > { %p59_p4 = por %p58_p1, %p57_p0  ;;  %p601_p5 = scmp.lt.s32.totalorder %s913_s22, 4 }
  0x14   : > { %p1005_p6 = por %p64_p3, %p63_p2  ;;  %s175_s27 = sand.u32 1, %s893_s17  }
  0x15   : > { %s556_s28 = sshll.u32 %s175_s27, 5  ;;  %s577_s29 = sshll.u32 %s909_s21, 5 }
  0x16   : > { %p1013_p7 = pnand %p601_p5, %p59_p4  ;;  %s197_s4 = sand.u32 1, %s913_s22  }
  0x17   : > { %s1236_s1 = sld [smem:[#allocation21_spill]]  ;;  %s201_s9 = scalar_lea.vmem [#allocation5], %s556_s28 }
  0x18   : > { %s212_s10 = sshll.u32 %s201_s9, 4  ;;  %s1021_s11 = scalar_lea.sflag [#allocation6], %s197_s4  ;;  %s213_s10 = int_to_ptr.vmem [resolvable:$true] %s212_s10 }
  0x19   : > { %p566_p8 = scmp.ge.s32.totalorder %s913_s22, 1  ;;  %p241_p9 = scmp.lt.s32.totalorder %s913_s22, 5 }
  0x1a   : > { %s1238_s0 = sld [smem:[#allocation20_spill]]  ;;  %s553_s25 = sadd.s32 4294967294, %s913_s22  }
  0x1b   : > { %p1028_p10 = pnand %p566_p8, %p241_p9  ;;  %s34_s24 = sadd.s32 1, %s905_s20 }
  0x1c   : > { %p35_p11 = scmp.ge.s32.totalorder %s34_s24, 2  ;;  %s108_s5 = sadd.s32 1, %s881_s14 }
  0x1d   : > { %s208_s7 = scalar_lea.hbm %s1236_s1, %s577_s29  ;;  %p115_p12 = scmp.ne.s32.totalorder %s881_s14, %s877_s13 }
  0x1e   : > { %s210_s8 = sshll.u32 %s208_s7, 4  ;;  %p121_p13 = scmp.ne.s32.totalorder %s877_s13, %s873_s12  ;;  %s211_s8 = int_to_ptr.hbm [resolvable:$true] %s210_s8 }
  0x1f   : > { %593 = dma.hbm_to_vmem [thread:$0]  (!%p1013_p7), %s211_s8, 512, %s213_s10, %s1021_s11  }
  0x20   : > { %s186_s4 = scalar_lea.hbm %s1238_s0, %s577_s29  ;;  %s179_s8 = scalar_lea.vmem [#allocation2], %s556_s28 }
  0x21   : > { %s188_s7 = sshll.u32 %s186_s4, 4  ;;  %s190_s9 = sshll.u32 %s179_s8, 4  ;;  %s189_s7 = int_to_ptr.hbm [resolvable:$true] %s188_s7  ;;  %s191_s9 = int_to_ptr.vmem [resolvable:$true] %s190_s9 }
  0x22   : > { %s176_s10 = scalar_lea.sflag [#allocation3], %s175_s27  ;;  %s1274_s24 = smov (%p35_p11, %s34_s24), 0 }
  0x23   : > { %590 = dma.hbm_to_vmem [thread:$0]  (!%p1013_p7), %s189_s7, 512, %s191_s9, %s176_s10  }
  0x24   : > { %1239 = sst [smem:[#allocation16_spill]] %s1274_s24  ;;  %s1240_s29 = sadd.s32 1, %s909_s21 }
  0x25   : > { %s1276_s29 = smov (!%p35_p11, %s1240_s29), %s909_s21  ;;  %s101_s28 = ssub.s32 %s905_s20, %s1274_s24 }
  0x26   : > { %p1053_p0 = por %p115_p12, %p58_p1  ;;  %p43_p2 = scmp.ge.s32.totalorder %s1276_s29, 2 }
  0x27   : > { %p1059_p4 = por %p121_p13, %p64_p3  ;;  %p149_p7 = scmp.eq.s32.totalorder %s991_s23, 3 }
  0x28   : > { %p155_p8 = scmp.eq.s32.totalorder %s553_s25, 3  ;;  %s1278_s29 = smov (%p43_p2, %s1276_s29), 0 }
  0x29   : > { %1243 = sst [smem:[#allocation17_spill]] %s1278_s29  ;;  %p1066_p9 = por %p149_p7, %p115_p12 }
  0x2a   : > { %p1070_p1 = por %p155_p8, %p121_p13  ;;  %s45_s7 = ssub.s32 %s909_s21, %s1278_s29 }
  0x2b   : > { %s1244_s6 = scalar_select %p1066_p9, 1, 0 }
  0x2c   : > { %s1246_s4 = scalar_select %p1070_p1, 1, 0 }
  0x2d   : > { %1245 = sst [smem:[#allocation18_spill]] %s1244_s6  ;;  %s221_s8 = sand.u32 1, %s881_s14  }
  0x2e   : > { %1247 = sst [smem:[#allocation19_spill]] %s1246_s4  ;;  %p48_p3 = scmp.eq.s32.totalorder %s45_s7, 0 }
  0x2f   : > { %s103_s9 = sor.u32 %s101_s28, %s45_s7  ;;  %s562_s25 = sshll.u32 %s221_s8, 5 }
  0x30   : > { %p106_p11 = scmp.eq.s32.totalorder %s103_s9, 0  ;;  %s1248_s10 = sadd.s32 1, %s893_s17 }
  0x31   : > { %s1080_s0 = scalar_select %p48_p3, %s893_s17, %s1248_s10  }
  0x32   : > { %s1083_s1 = scalar_select %p106_p11, %s881_s14, %s108_s5  }
  0x33   : > { %s563_s24 = sshll.u32 %s909_s21, 2  ;;  %s564_s12 = sshll.u32 %s905_s20, 3 }
  0x34   : > { %s223_s6 = scalar_lea.vmem [#allocation7], %s562_s25  ;;  %s230_s18 = sadd.s32 %s564_s12, %s563_s24 }
  0x35   : > { %s236_s3 = sshll.u32 %s223_s6, 4  ;;  %s565_s19 = sshll.u32 %s230_s18, 3  ;;  %s237_s3 = int_to_ptr.vmem [resolvable:$true] %s236_s3 }
  0x36   : > { %p594_p12 = pnand %p601_p5, %p1053_p0  ;;  %s232_s28 = scalar_lea.hbm %s1219_s2, %s565_s19 }
  0x37   : > { %s234_s7 = sshll.u32 %s232_s28, 4  ;;  %245 = sbr.rel (%p1028_p10) target bundleno = 211 (0xd3), region = 32  ;;  %s235_s7 = int_to_ptr.hbm [resolvable:$true] %s234_s7 }
  0x38   : > { %596 = dma.hbm_to_vmem [thread:$0]  (!%p594_p12), %s235_s7, 512, %s237_s3, %s1021_s11  }
  0x39   : > { %s247_s5 = sand.u32 (!%p1028_p10), 1, %s889_s16  }
  0x3a   : > { %s567_s6 = sshll.u32 (!%p1028_p10), %s247_s5, 5  ;;  %s248_s12 = scalar_lea.sflag (!%p1028_p10), [#allocation3], %s247_s5 }
  0x3b   : > { %s1098_s18 = scalar_lea.vmem (!%p1028_p10), [#allocation2], %s567_s6 }
  0x3c   : > { %856 = dma.done.wait (%p1005_p6), %s248_s12, 512  }
  0x3d   : > { %858 = vsyncadd (%p1005_p6), %s248_s12, 4294966784  ;;  %s257_s19 = sand.u32 1, %s991_s23   ;;  %s1105_s3 = scalar_lea.vmem [#allocation5], %s567_s6 }
  0x3e   : > { %s258_s24 = scalar_lea.sflag [#allocation6], %s257_s19 }
  0x3f   : > { %860 = dma.done.wait (%p1005_p6), %s258_s24, 512  }
  0x40   : > { %862 = vsyncadd (%p1005_p6), %s258_s24, 4294966784  ;;  %s269_s11 = sand.u32 1, %s877_s13  }
  0x41   : > { %s1114_s15 = sshll.u32 %s269_s11, 5 }
  0x42   : > { %s271_s29 = scalar_lea.vmem [#allocation7], %s1114_s15 }
  0x43   : > { %864 = dma.done.wait (%p1059_p4), %s258_s24, 512  }
  0x44   : > { %866 = vsyncadd (%p1059_p4), %s258_s24, 4294966784  ;;  %v311_v0 = vld [vmem:[%s271_s29 + $0x10] sm:$0xff]  ;;  %v309_v1 = vld [vmem:[%s271_s29] sm:$0xff]  ;;  %s915_s23 = smov 127   ;;  %s916_s26 = smov 1   ;;  %v321_v4 = vlaneseq }
  0x45   : > { %317 = vrot.lane.b32.xlu1 %v311_v0, %s915_s23  ;;  %313 = vrot.lane.b32.xlu0 %v309_v1, %s915_s23  ;;  %v312_v2 = vld [vmem:[%s271_s29 + $0x18] sm:$0xff]  ;;  %v310_v3 = vld [vmem:[%s271_s29 + $0x8] sm:$0xff]  ;;  %s1249_s27 = sld [smem:[#allocation15_spill]]  ;;  %s1131_s10 = scalar_lea.vmem [#allocation8], %s1114_s15 }
  0x46   : > { %328 = vrot.lane.b32.xlu2 %v309_v1, %s916_s26  ;;  %v322_v6 = vand.u32 127, %v321_v4  ;;  %s1250_s30 = sld [smem:[#allocation14_spill]]  ;;  %v365_v12 = vld [vmem:[%s1098_s18 + $0x8] sm:$0xff]  ;;  %v366_v26 = vld [vmem:[%s1098_s18 + $0x10] sm:$0xff]  ;;  %v364_v27 = vld [vmem:[%s1098_s18] sm:$0xff]  ;;  %s389_s24 = scalar_lea.sflag [#allocation4], %s269_s11 }
  0x47   : > { %v373_v17 = vld [vmem:[%s1105_s3 + $0x8] sm:$0xff]  ;;  %v369_v19 = vmul.f32 %v365_v12, %v310_v3  ;;  %v367_v28 = vld [vmem:[%s1098_s18 + $0x18] sm:$0xff]  ;;  %v370_v30 = vmul.f32 %v366_v26, %v311_v0  ;;  %v368_v34 = vmul.f32 %v364_v27, %v309_v1  ;;  %v372_v38 = vld [vmem:[%s1105_s3] sm:$0xff]  ;;  %s1257_s5 = sld [smem:[#allocation22_spill]]  ;;  %s406_s18 = sshll.u32 %s1131_s10, 4  ;;  %s407_s18 = int_to_ptr.vmem [resolvable:$true] %s406_s18 }
  0x48   : > { %v341_v7 = vadd.s32 128, %v322_v6  ;;  %vm336_vm0 = vcmp.lt.s32.totalorder %v322_v6, 1  ;;  %vm323_vm1 = vcmp.lt.s32.totalorder %v322_v6, 127  ;;  %v342_v14 = vadd.s32 256, %v322_v6  ;;  %v374_v40 = vld [vmem:[%s1105_s3 + $0x10] sm:$0xff]  ;;  %v375_v41 = vld [vmem:[%s1105_s3 + $0x18] sm:$0xff] }
  0x49   : > { %v343_v15 = vadd.s32 384, %v322_v6  ;;  %v344_v23 = vand.u32 1, %v322_v6  ;;  %v371_v35 = vmul.f32 %v367_v28, %v312_v2 }
  0x4a   : > { %v345_v10 = vand.u32 1, %v341_v7  ;;  %v346_v24 = vand.u32 1, %v342_v14 }
  0x4b   : > { %s572_s4 = sshll.u32 %s1249_s27, 2  ;;  %v347_v25 = vand.u32 1, %v343_v15  ;;  %vm1134_vm3 = vcmp.eq.s32.totalorder %v344_v23, 0 }
  0x4c   : > { %vm349_vm2 = vcmp.eq.s32.totalorder %v345_v10, 0  ;;  %s573_s8 = sshll.u32 %s1250_s30, 3  ;;  %vm1138_vm4 = vcmp.eq.s32.totalorder %v346_v24, 0 }
  0x4d   : > { %319 = vrot.lane.b32.xlu1 %v312_v2, %s915_s23  ;;  %315 = vrot.lane.b32.xlu0 %v310_v3, %s915_s23  ;;  %s402_s9 = sadd.s32 %s573_s8, %s572_s4  ;;  %vm1142_vm5 = vcmp.eq.s32.totalorder %v347_v25, 0 }
  0x4e   : > { %330 = vrot.lane.b32.xlu2 %v310_v3, %s916_s26  ;;  %s574_s25 = sshll.u32 %s402_s9, 3 }
  0x4f   : > { %s404_s6 = scalar_lea.hbm %s1257_s5, %s574_s25 }
  0x50   : > { %s408_s19 = sshll.u32 %s404_s6, 4  ;;  %s409_s19 = int_to_ptr.hbm [resolvable:$true] %s408_s19 }
  0x51   : > { %s797_s3 = sshra.s32 %s409_s19, 4  ;;  %s798_s3 = int_to_ptr.hbm [resolvable:$true] %s797_s3 }
  0x52   : > { %s799_s15 = scalar_lea.hbm %s798_s3, 32  ;;  %p804_p13 = scmp.lt.s32.totalorder %s798_s3, %s1257_s5 }
  0x53   : > { %p800_p5 = scmp.ne.s32.totalorder %s798_s3, %s799_s15 }
  0x55   : > { %334 = vrot.lane.b32.xlu1 %v312_v2, %s916_s26  ;;  %332 = vrot.lane.b32.xlu0 %v311_v0, %s916_s26  ;;  %p801_p6 = pnand %p800_p5, %p1066_p9  ;;  %s803_s26 = scalar_lea.hbm %s1257_s5, 128 }
  0x56   : > { %p805_p0 = scmp.lt.s32.totalorder %s803_s26, %s799_s15 }
  0x57   : > { %p802_p10 = pneg %p801_p6 }
  0x58   : > { %p806_p2 = por %p805_p0, %p804_p13 }
  0x5a   : > { %p807_p4 = pnand %p806_p2, %p802_p10 }
  0xa0   : > { %v329_v5 = vpop.permute.xlu2 %328 }
  0xa8   : > { %v331_v11 = vpop.permute.xlu2 %330 }
  0xa9   : > { %v339_v13 = vsel %vm336_vm0, %v329_v5, %v331_v11 }
  0xb7   : > { %v318_v8 = vpop.permute.xlu1 %317  ;;  %v314_v9 = vpop.permute.xlu0 %313 }
  0xbf   : > { %v320_v16 = vpop.permute.xlu1 %319  ;;  %v316_v18 = vpop.permute.xlu0 %315 }
  0xc0   : > { %v325_v20 = vsel %vm323_vm1, %v316_v18, %v318_v8  ;;  %v324_v36 = vsel %vm323_vm1, %v318_v8, %v320_v16  ;;  %v327_v37 = vsel %vm323_vm1, %v320_v16, %v314_v9  ;;  %v326_v43 = vsel %vm323_vm1, %v314_v9, %v316_v18 }
  0xc1   : > { %v361_v21 = vsel %vm349_vm2, %v325_v20, %v339_v13 }
  0xc2   : > { %v377_v22 = vmul.f32 %v373_v17, %v361_v21 }
  0xc4   : > { %v381_v29 = vadd.f32 %v377_v22, %v369_v19 }
  0xc6   : > { %385 = vst [vmem:[%s1131_s10 + $0x8] sm:$0xff] %v381_v29 }
  0xc7   : > { %v335_v39 = vpop.permute.xlu1 %334  ;;  %v333_v42 = vpop.permute.xlu0 %332 }
  0xc8   : > { %v340_v44 = vsel %vm336_vm0, %v335_v39, %v329_v5  ;;  %v337_v45 = vsel %vm336_vm0, %v333_v42, %v335_v39  ;;  %v338_v46 = vsel %vm336_vm0, %v331_v11, %v333_v42 }
  0xc9   : > { %v360_v47 = vsel %vm1134_vm3, %v326_v43, %v340_v44  ;;  %v362_v48 = vsel %vm1138_vm4, %v324_v36, %v338_v46  ;;  %v363_v49 = vsel %vm1142_vm5, %v327_v37, %v337_v45 }
  0xca   : > { %v376_v50 = vmul.f32 %v372_v38, %v360_v47  ;;  %v378_v51 = vmul.f32 %v374_v40, %v362_v48  ;;  %v379_v52 = vmul.f32 %v375_v41, %v363_v49 }
  0xcc   : > { %v380_v53 = vadd.f32 %v376_v50, %v368_v34  ;;  %v382_v54 = vadd.f32 %v378_v51, %v370_v30  ;;  %v383_v55 = vadd.f32 %v379_v52, %v371_v35 }
  0xce   : > { %384 = vst [vmem:[%s1131_s10] sm:$0xff] %v380_v53 }
  0xcf   : > { %386 = vst [vmem:[%s1131_s10 + $0x10] sm:$0xff] %v382_v54 }
  0xd0   : > { %387 = vst [vmem:[%s1131_s10 + $0x18] sm:$0xff] %v383_v55 }
  0xd1   : > { %810 = shalt.err (!%p807_p4)
}
  0xd2   : > { %585 = dma.vmem_to_hbm [thread:$0]  (%p1066_p9), %s407_s18, 512, %s409_s19, %s389_s24  }
  0xd3 PF: > { %s1259_s11 = sld [smem:[#allocation13_spill]]  ;;  %p602_p7 = scmp.ge.s32.totalorder %s913_s22, 2 }
  0xd5   : > { %p598_p8 = pnand %p602_p7, %p1070_p1 }
  0xd7   : > { %p599_p3 = pneg %p598_p8 }
  0xd9   : > { %s420_s8 = sand.u32 1, %s1259_s11  }
  0xda   : > { %s421_s9 = scalar_lea.sflag [#allocation4], %s420_s8 }
  0xdb   : > { %868 = dma.done.wait (%p599_p3), %s421_s9, 512  }
  0xdc   : > { %870 = vsyncadd (%p599_p3), %s421_s9, 4294966784  ;;  %s22_s22 = sadd.s32 1, %s913_s22   ;;  %s1261_s25 = sld [smem:[#allocation16_spill]] }
  0xdd   : > { %p19_p11 = scmp.ge.s32.totalorder %s22_s22, 6   ;;  %s1262_s10 = sld [smem:[#allocation17_spill]] }
  0xde   : > { %s1263_s12 = smov %s877_s13  ;;  %s1264_s13 = smov %s881_s14 }
  0xdf   : > { %s1265_s14 = smov %s1083_s1  ;;  %s1266_s15 = smov %s889_s16 }
  0xe0   : > { %s1267_s16 = smov %s893_s17  ;;  %s1268_s17 = smov %s1080_s0 }
  0xe1   : > { %s1269_s18 = smov %s905_s20  ;;  %s1270_s19 = smov %s909_s21 }
  0xe2   : > { %s1271_s20 = smov %s1261_s25  ;;  %21 = sbr.rel (!%p19_p11) target bundleno = 15 (0xf), region = 101 }
  0xe3   : > { %s1272_s21 = smov %s1262_s10 }
  0xe7   :  { %427 = vsyncpa [#allocation3], 1 }
  0xe8   :  { %429 = vsyncpa [#allocation3 + $0x1], 1 }
  0xe9   :  { %430 = vsyncpa [#allocation6], 1 }
  0xea   :  { %432 = vsyncpa [#allocation6 + $0x1], 1 }
  0xeb   :  { %433 = vsyncpa [#allocation4], 1 }
  0xec   :  { %435 = vsyncpa [#allocation4 + $0x1], 1 }

</bundles_post_ra>
